<compile_context>
chip_gen: v5e
topology: v5e:2x2
jax: 0.10.0
libtpu: 0.0.40
codegen_flags: <defaults>
</compile_context>

<pallas_src>
import math

import jax
import jax.numpy as jnp
from jax.experimental import pallas as pl
from jax.experimental.pallas import tpu as pltpu


# ---------------------------------------------------------------------------
# Pallas kernels
#   x_ref:   (tm, tn) in the caller's dtype
#   emb_ref: (tm, Ha) f32   -- Time2Vec embedding with a ones column appended
#   w*_ref:  (Ha, tn) f32   -- weights with the bias row folded in
# ---------------------------------------------------------------------------
def _timerelu_leaky_kernel(x_ref, emb_ref, wm_ref, wa_ref, o_ref):
    emb = emb_ref[...]
    thr = jnp.dot(emb, wm_ref[...], preferred_element_type=jnp.float32)
    alpha = jnp.dot(emb, wa_ref[...], preferred_element_type=jnp.float32)
    x = x_ref[...].astype(jnp.float32)
    o_ref[...] = jnp.where(x > thr, x, alpha * x + thr).astype(o_ref.dtype)


def _timerelu_kernel(x_ref, emb_ref, wm_ref, o_ref):
    emb = emb_ref[...]
    thr = jnp.dot(emb, wm_ref[...], preferred_element_type=jnp.float32)
    x = x_ref[...].astype(jnp.float32)
    # non-leaky: alphas == 0.0 ; keep the 0.0*x so NaN/Inf inputs propagate
    # exactly like torch's `alphas * X + thresholds`.
    o_ref[...] = jnp.where(x > thr, x, 0.0 * x + thr).astype(o_ref.dtype)


# ---------------------------------------------------------------------------
# Parameter initialization (deterministic, mimics nn.Linear default init)
# ---------------------------------------------------------------------------
def _linear_init(key, in_features, out_features):
    k = 1.0 / math.sqrt(in_features)
    kw, kb = jax.random.split(key)
    # stored as (in, out) -- i.e. torch weight (out, in) transposed
    w = jax.random.uniform(kw, (in_features, out_features), jnp.float32, -k, k)
    b = jax.random.uniform(kb, (1, out_features), jnp.float32, -k, k)
    return w, b


def init_timerelu_params(key, data_shape, time_shape, leaky=True,
                         time2vec_hidden_shape=8):
    k1, k2, k3 = jax.random.split(key, 3)
    wt, bt = _linear_init(k1, time_shape, time2vec_hidden_shape)      # Time2Vec.mat
    wm, bm = _linear_init(k2, time2vec_hidden_shape, data_shape)      # self.model
    params = {"wt": wt, "bt": bt, "wm": wm, "bm": bm}
    if leaky:
        wa, ba = _linear_init(k3, time2vec_hidden_shape, data_shape)  # self.model_alpha
        params["wa"] = wa
        params["ba"] = ba
    return params


# ---------------------------------------------------------------------------
# Wrapper
# ---------------------------------------------------------------------------
def _round_up(x, m):
    return ((x + m - 1) // m) * m


def timerelu_forward(X, times, params, leaky=True):
    """TimeReLU(data_shape=prod(X.shape[1:]), time_shape=times.shape[-1],
    leaky=leaky, time2vec=True) forward pass (dtype-preserving)."""
    orig_shape = X.shape
    out_dtype = X.dtype
    B = orig_shape[0]
    Xf = X.reshape(B, -1)                 # torch .view(B, -1); no copy, no pad
    D = Xf.shape[1]

    if times.ndim == 1:
        times = times[:, None]
    times = times.astype(jnp.float32)

    wt, bt = params["wt"], params["bt"]
    wm, bm = params["wm"], params["bm"]
    H = wt.shape[1]

    # ---- Time2Vec hoisted out of the kernel (tiny: (B, H)) ----
    emb = times @ wt + bt
    emb = jnp.concatenate([emb[:, :1], jnp.sin(emb[:, 1:])], axis=1)
    # Fold the Linear biases into the MXU matmul: ones column / bias row.
    emb_aug = jnp.concatenate([emb, jnp.ones((B, 1), jnp.float32)], axis=1)
    Ha = H + 1
    wm_aug = jnp.concatenate([wm, bm], axis=0)            # (Ha, D)

    # ---- tiling: no padding of X / out; ragged edges masked by Pallas ----
    tm = B if B <= 256 else 256                           # full-extent or /8
    tn = min(1024, _round_up(D, 128))                     # lane-dense, VMEM-safe
    grid_i = pl.cdiv(B, tm)
    grid_j = pl.cdiv(D, tn)
    if grid_i * grid_j == 1 and D > 128:
        # v7x megacore: guarantee >= 2 tiles so both TensorCores get work.
        tn = _round_up(pl.cdiv(D, 2), 128)
        grid_j = pl.cdiv(D, tn)
    grid = (grid_i, grid_j)

    x_spec = pl.BlockSpec((tm, tn), lambda i, j: (i, j))
    emb_spec = pl.BlockSpec((tm, Ha), lambda i, j: (i, 0))
    w_spec = pl.BlockSpec((Ha, tn), lambda i, j: (0, j))

    if leaky:
        wa_aug = jnp.concatenate([params["wa"], params["ba"]], axis=0)
        inputs = (Xf, emb_aug, wm_aug, wa_aug)
        in_specs = [x_spec, emb_spec, w_spec, w_spec]
        kernel = _timerelu_leaky_kernel
    else:
        inputs = (Xf, emb_aug, wm_aug)
        in_specs = [x_spec, emb_spec, w_spec]
        kernel = _timerelu_kernel

    itemsize = jnp.dtype(out_dtype).itemsize
    n_mm = 2 if leaky else 1
    cost = pl.CostEstimate(
        flops=int(B * D * (2 * Ha * n_mm + 3)),
        transcendentals=0,                                # sin is in the wrapper
        bytes_accessed=int(2 * B * D * itemsize           # X read + out write
                           + grid_i * n_mm * Ha * D * 4   # wm/wa refetch per B-tile
                           + grid_j * B * Ha * 4),        # emb refetch per D-tile
    )

    out = pl.pallas_call(
        kernel,
        out_shape=jax.ShapeDtypeStruct((B, D), out_dtype),
        grid=grid,
        in_specs=in_specs,
        out_specs=x_spec,
        compiler_params=pltpu.CompilerParams(
            dimension_semantics=("parallel", "parallel")),
        cost_estimate=cost,
    )(*inputs)

    return out.reshape(orig_shape)


# ---------------------------------------------------------------------------
# Pure-JAX reference (for correctness check)
# ---------------------------------------------------------------------------
def timerelu_reference(X, times, params, leaky=True):
    orig_shape = X.shape
    B = orig_shape[0]
    Xf = X.reshape(B, -1).astype(jnp.float32)
    if times.ndim == 1:
        times = times[:, None]
    emb = times.astype(jnp.float32) @ params["wt"] + params["bt"]
    emb = jnp.concatenate([emb[:, :1], jnp.sin(emb[:, 1:])], axis=1)
    thr = emb @ params["wm"] + params["bm"]
    alpha = (emb @ params["wa"] + params["ba"]) if leaky else 0.0
    out = jnp.where(Xf > thr, Xf, alpha * Xf + thr)
    return out.astype(X.dtype).reshape(orig_shape)


# ---------------------------------------------------------------------------
if __name__ == "__main__":
    key = jax.random.PRNGKey(0)
    kx, kt, kp = jax.random.split(key, 3)

    TIME_SHAPE = 1
    T2V_HIDDEN = 8

    # (shape, dtype, abs tolerance); second case exercises ragged D tiling
    # (D = 2352, not a multiple of 128), third exercises the dtype-preserving
    # (bf16) HBM path.
    cases = [
        ((2, 4, 16, 16), jnp.float32, 1e-5),
        ((4, 3, 28, 28), jnp.float32, 1e-5),
        ((2, 4, 16, 16), jnp.bfloat16, 5e-2),
    ]

    for shape, dtype, tol in cases:
        data_shape = math.prod(shape[1:])
        X = jax.random.normal(kx, shape, jnp.float32).astype(dtype)
        times = jax.random.uniform(kt, (shape[0], TIME_SHAPE), jnp.float32)
        for leaky in (True, False):
            params = init_timerelu_params(kp, data_shape, TIME_SHAPE,
                                          leaky=leaky,
                                          time2vec_hidden_shape=T2V_HIDDEN)
            out = jax.block_until_ready(
                timerelu_forward(X, times, params, leaky=leaky))
            ref = timerelu_reference(X, times, params, leaky=leaky)
            assert out.shape == X.shape, (out.shape, X.shape)
            assert out.dtype == X.dtype, (out.dtype, X.dtype)
            err = float(jnp.max(jnp.abs(out.astype(jnp.float32)
                                        - ref.astype(jnp.float32))))
            assert err <= tol, \
                f"mismatch shape={shape} dtype={dtype} leaky={leaky} err={err}"

    print("KERNEL_OK")
</pallas_src>

<mosaic_0001>
module attributes {stable_mosaic.version = 11 : i64} {
  func.func @_timerelu_leaky_kernel(%arg0: i32, %arg1: i32, %arg2: memref<2x512xf32, #tpu.memory_space<vmem>>, %arg3: memref<2x9xf32, #tpu.memory_space<vmem>>, %arg4: memref<9x512xf32, #tpu.memory_space<vmem>>, %arg5: memref<9x512xf32, #tpu.memory_space<vmem>>, %arg6: memref<2x512xf32, #tpu.memory_space<vmem>>) attributes {dimension_semantics = [#tpu.dimension_semantics<parallel>, #tpu.dimension_semantics<parallel>], iteration_bounds = array<i64: 1, 2>, scalar_prefetch = 0 : i64, scratch_operands = 0 : i64, tpu.core_type = #tpu.core_type<tc>, window_params = [{transform_indices = @transform_0, window_bounds = array<i64: 2, 512>}, {transform_indices = @transform_1, window_bounds = array<i64: 2, 9>}, {transform_indices = @transform_2, window_bounds = array<i64: 9, 512>}, {transform_indices = @transform_3, window_bounds = array<i64: 9, 512>}, {transform_indices = @transform_4, window_bounds = array<i64: 2, 512>}]} {
    %c0 = arith.constant 0 : index
    %c0_0 = arith.constant 0 : index
    %0 = vector.load %arg3[%c0, %c0_0] : memref<2x9xf32, #tpu.memory_space<vmem>>, vector<2x9xf32>
    %c0_1 = arith.constant 0 : index
    %c0_2 = arith.constant 0 : index
    %1 = vector.load %arg4[%c0_1, %c0_2] : memref<9x512xf32, #tpu.memory_space<vmem>>, vector<9x512xf32>
    %cst = arith.constant dense<0.000000e+00> : vector<2x512xf32>
    %2 = tpu.matmul %0, %1, %cst {dimension_numbers = #tpu.dot_dimension_numbers<[1], [0], [0], [1], [0, 0, 1, 1], [], []>} : vector<2x9xf32>, vector<9x512xf32>, vector<2x512xf32> -> vector<2x512xf32>
    %c0_3 = arith.constant 0 : index
    %c0_4 = arith.constant 0 : index
    %3 = vector.load %arg5[%c0_3, %c0_4] : memref<9x512xf32, #tpu.memory_space<vmem>>, vector<9x512xf32>
    %cst_5 = arith.constant dense<0.000000e+00> : vector<2x512xf32>
    %4 = tpu.matmul %0, %3, %cst_5 {dimension_numbers = #tpu.dot_dimension_numbers<[1], [0], [0], [1], [0, 0, 1, 1], [], []>} : vector<2x9xf32>, vector<9x512xf32>, vector<2x512xf32> -> vector<2x512xf32>
    %c0_6 = arith.constant 0 : index
    %c0_7 = arith.constant 0 : index
    %5 = vector.load %arg2[%c0_6, %c0_7] : memref<2x512xf32, #tpu.memory_space<vmem>>, vector<2x512xf32>
    %6 = arith.cmpf ogt, %5, %2 : vector<2x512xf32>
    %7 = arith.mulf %4, %5 : vector<2x512xf32>
    %8 = arith.addf %7, %2 : vector<2x512xf32>
    %9 = arith.select %6, %5, %8 : vector<2x512xi1>, vector<2x512xf32>
    %c0_8 = arith.constant 0 : index
    %c0_9 = arith.constant 0 : index
    %10 = vector.load %arg6[%c0_8, %c0_9] : memref<2x512xf32, #tpu.memory_space<vmem>>, vector<2x512xf32>
    tpu.vector_store %arg6[%c0_8, %c0_9], %9 {strides = array<i32>} : memref<2x512xf32, #tpu.memory_space<vmem>>, vector<2x512xf32>,
    return
  }
  func.func @transform_0(%arg0: i32, %arg1: i32) -> (i32, i32) {
    %c0_i32 = arith.constant 0 : i32
    return %arg0, %arg1 : i32, i32
  }
  func.func @transform_1(%arg0: i32, %arg1: i32) -> (i32, i32) {
    %c0_i32 = arith.constant 0 : i32
    %c0_i32_0 = arith.constant 0 : i32
    return %arg0, %c0_i32 : i32, i32
  }
  func.func @transform_2(%arg0: i32, %arg1: i32) -> (i32, i32) {
    %c0_i32 = arith.constant 0 : i32
    %c0_i32_0 = arith.constant 0 : i32
    return %c0_i32, %arg1 : i32, i32
  }
  func.func @transform_3(%arg0: i32, %arg1: i32) -> (i32, i32) {
    %c0_i32 = arith.constant 0 : i32
    %c0_i32_0 = arith.constant 0 : i32
    return %c0_i32, %arg1 : i32, i32
  }
  func.func @transform_4(%arg0: i32, %arg1: i32) -> (i32, i32) {
    %c0_i32 = arith.constant 0 : i32
    return %arg0, %arg1 : i32, i32
  }
}

</mosaic_0001>

<bundles_post_ra>
// kernel: tpu_custom_call.1
= control target key start
LH: loop header
LB: loop body
LE: loop exit
PB: predicated region body
PF: predicated region fallthrough
CT: control target
= control target key end

     0   :  { %9 = vsyncpa [#allocation3], 0  ;;  %s1319_s0 = inlined_call_operand.hbm [shape: f32[2,1024], index: 0, kind: input, shape index: {}]   ;;  %s1320_s1 = inlined_call_operand.hbm [shape: f32[2,9], index: 1, kind: input, shape index: {}]   ;;  %s1321_s2 = inlined_call_operand.hbm [shape: f32[9,1024], index: 2, kind: input, shape index: {}]   ;;  %s1322_s3 = inlined_call_operand.hbm [shape: f32[9,1024], index: 3, kind: input, shape index: {}]   ;;  %s1323_s4 = inlined_call_operand.hbm [shape: f32[2,1024], index: 4, kind: output, shape index: {}]  }
   0x1   :  { %11 = vsyncpa [#allocation3 + $0x1], 0 }
   0x2   :  { %12 = vsyncpa [#allocation6], 0 }
   0x3   :  { %13 = vsyncpa [#allocation4], 0 }
   0x4   :  { %15 = vsyncpa [#allocation4 + $0x1], 0  ;;  %s1118_s15 = smov 0   ;;  %s1120_s16 = smov 0  }
   0x5   :  { %s1122_s17 = smov 0   ;;  %s1124_s18 = smov 0  }
   0x6   :  { %s1126_s19 = smov 0   ;;  %s1128_s20 = smov 0  }
   0x7 LB: > { %s30_s21 = sadd.s32 1, %s1083_s19  ;;  %s42_s22 = sadd.s32 1, %s1075_s17  ;;  %s1087_s20 = sphi %s1128_s20, %s21_s20   ;;  %s1083_s19 = sphi %s1126_s19, %s1333_s19   ;;  %s1079_s18 = sphi %s1124_s18, %s1332_s18   ;;  %s1075_s17 = sphi %s1122_s17, %s1331_s17   ;;  %s1071_s16 = sphi %s1120_s16, %s1330_s16   ;;  %s1067_s15 = sphi %s1118_s15, %s1329_s15  }
   0x8   : > { %p31_p0 = scmp.ge.s32.totalorder %s30_s21, 2  ;;  %p49_p1 = scmp.ne.s32.totalorder %s1075_s17, %s1071_s16 }
   0x9   : > { %p50_p2 = scmp.eq.s32.totalorder %s1087_s20, 0  ;;  %p750_p3 = scmp.ge.s32.totalorder %s1087_s20, 2 }
   0xa   : > { %s1335_s21 = smov (%p31_p0, %s30_s21), 0  ;;  %p822_p5 = scmp.lt.s32.totalorder %s1087_s20, 2 }
   0xb   : > { %p1159_p4 = por %p50_p2, %p49_p1  ;;  %s38_s24 = ssub.s32 %s1083_s19, %s1335_s21 }
   0xc   : > { %s199_s25 = sand.u32 1, %s1087_s20   ;;  %p40_p6 = scmp.eq.s32.totalorder %s38_s24, 0 }
   0xd   : > { %s201_s26 = sand.u32 1, %s1075_s17   ;;  %s787_s27 = sshll.u32 %s1083_s19, 3 }
   0xe   : > { %s1170_s28 = scalar_select %p40_p6, %s1075_s17, %s42_s22  }
   0xf   : > { %s751_s29 = sshll.u32 %s201_s26, 3  ;;  %s210_s6 = scalar_lea.hbm %s1319_s0, %s787_s27 }
  0x10   : > { %s212_s7 = sshll.u32 %s210_s6, 4  ;;  %s203_s8 = scalar_lea.vmem [#allocation2], %s751_s29  ;;  %s213_s7 = int_to_ptr.hbm [resolvable:$true] %s212_s7 }
  0x11   : > { %s214_s9 = sshll.u32 %s203_s8, 4  ;;  %p1179_p7 = pnand %p822_p5, %p1159_p4  ;;  %s215_s9 = int_to_ptr.vmem [resolvable:$true] %s214_s9 }
  0x12   : > { %s754_s11 = sshll.u32 %s201_s26, 6  ;;  %s788_s12 = sshll.u32 %s1083_s19, 5 }
  0x13   : > { %s1184_s13 = scalar_lea.sflag [#allocation3], %s199_s25  ;;  %s230_s23 = scalar_lea.hbm %s1321_s2, %s788_s12 }
  0x14   : > { %810 = dma.hbm_to_vmem [thread:$0]  (!%p1179_p7), %s213_s7, 128, %s215_s9, %s1184_s13  }
  0x15   : > { %s225_s24 = scalar_lea.vmem [#allocation7], %s754_s11  ;;  %s231_s29 = sshll.u32 %s230_s23, 4  ;;  %s232_s29 = int_to_ptr.hbm [resolvable:$true] %s231_s29 }
  0x16   : > { %s233_s27 = sshll.u32 %s225_s24, 4  ;;  %s252_s30 = scalar_lea.hbm %s1322_s3, %s788_s12  ;;  %s234_s27 = int_to_ptr.vmem [resolvable:$true] %s233_s27 }
  0x17   : > { %s247_s5 = scalar_lea.vmem [#allocation8], %s754_s11  ;;  %s253_s7 = sshll.u32 %s252_s30, 4  ;;  %s254_s7 = int_to_ptr.hbm [resolvable:$true] %s253_s7 }
  0x18   : > { %s1195_s6 = sshll.u32 %s247_s5, 4  ;;  %s1089_s8 = smov 1024   ;;  %s256_s6 = int_to_ptr.vmem [resolvable:$true] %s1195_s6 }
  0x19   : > { %s1090_s9 = smov 512   ;;  %s1091_s14 = smov 32  }
  0x1a   : > { %813 = dma.hbm_to_vmem [thread:$0]  (!%p1179_p7), %s232_s29, 1024, %s234_s27, %s1184_s13, %s1089_s8, %s1090_s9, %s1091_s14  }
  0x1b   : > { %s1202_s22 = sadd.s32 4294967295, %s1087_s20   ;;  %s747_s11 = sadd.s32 4294967294, %s1087_s20  }
  0x1c   : > { %p55_p8 = scmp.ne.s32.totalorder %s1071_s16, %s1067_s15  ;;  %p56_p9 = scmp.eq.s32.totalorder %s1202_s22, 0 }
  0x1d   : > { %p159_p10 = scmp.eq.s32.totalorder %s1202_s22, 1  ;;  %p165_p11 = scmp.eq.s32.totalorder %s747_s11, 1 }
  0x1e   : > { %p1211_p12 = por %p56_p9, %p55_p8  ;;  %p748_p13 = scmp.ge.s32.totalorder %s1087_s20, 1 }
  0x1f   : > { %p1219_p0 = por %p159_p10, %p49_p1  ;;  %p1223_p2 = por %p165_p11, %p55_p8 }
  0x20   : > { %p172_p4 = scmp.lt.s32.totalorder %s1087_s20, 3  ;;  %s186_s26 = sshll.u32 %s1320_s1, 4  ;;  %s187_s26 = int_to_ptr.hbm [resolvable:$true] %s186_s26 }
  0x21   : > { %s1092_s25 = smov [#allocation5]  }
  0x22   : > { %p173_p5 = pnand %p748_p13, %p172_p4  ;;  %s188_s30 = sshll.u32 %s1092_s25, 4  ;;  %s189_s30 = int_to_ptr.vmem [resolvable:$true] %s188_s30 }
  0x23   : > { %816 = dma.hbm_to_vmem [thread:$0]  (!%p1179_p7), %s254_s7, 1024, %s256_s6, %s1184_s13, %s1089_s8, %s1090_s9, %s1091_s14  }
  0x24   : > { %p803_p6 = pneg %p173_p5  ;;  %267 = sbr.rel (%p173_p5) target bundleno = 205 (0xcd), region = 36 }
  0x25   : > { %s269_s5 = sand.u32 (!%p173_p5), 1, %s1202_s22   ;;  %s1238_s11 = sand.u32 (!%p173_p5), 1, %s1071_s16  }
  0x26   : > { %p804_p1 = pnand %p803_p6, %p56_p9  ;;  %s761_s27 = sshll.u32 (!%p173_p5), %s1238_s11, 3 }
  0x27   : > { %s270_s29 = scalar_lea.sflag (!%p173_p5), [#allocation3], %s269_s5  ;;  %s1243_s25 = scalar_lea.vmem (!%p173_p5), [#allocation2], %s761_s27 }
  0x28   : > { %806 = dma.hbm_to_vmem [thread:$0]  (!%p804_p1), %s187_s26, 32, %s189_s30, [#allocation6]  }
  0x29   : > { %1050 = dma.done.wait (%p1211_p12), %s270_s29, 128  }
  0x2a   : > { %1052 = vsyncadd (%p1211_p12), %s270_s29, 4294967168 }
  0x2b   : > { %1054 = dma.done.wait (%p56_p9), [#allocation6], 32  }
  0x2c   : > { %1056 = vsyncadd (%p56_p9), [#allocation6], 4294967264  ;;  %s763_s10 = sshll.u32 %s1238_s11, 6 }
  0x2d   : > { %s288_s13 = scalar_lea.vmem [#allocation7], %s763_s10 }
  0x2e   : > { %1058 = dma.done.wait (%p1211_p12), %s270_s29, 2048  }
  0x2f   : > { %1060 = vsyncadd (%p1211_p12), %s270_s29, 4294965248  ;;  %vm351_vm0 = vcmask 1040384   ;;  %v343_v0 = vld [vmem:[%s288_s13 + $0x20] sm:$0x1]  ;;  %v344_v1 = vld [vmem:[%s288_s13 + $0x28] sm:$0x1] }
  0x30   : > { %v345_v2 = vld [vmem:[%s288_s13 + $0x30] sm:$0x1]  ;;  %766 = vmatpush.msk.msra.mxu0 %vm351_vm0, %v343_v0  ;;  %768 = vmatpush.msk.msra.mxu1 %vm351_vm0, %v344_v1  ;;  %v346_v3 = vld [vmem:[%s288_s13 + $0x38] sm:$0x1]  ;;  %v339_v4 = vld [vmem:[%s288_s13] sm:$0xff]  ;;  %vm347_vm1 = vcmask 72704  }
  0x31   : > { %v340_v5 = vld [vmem:[%s288_s13 + $0x8] sm:$0xff]  ;;  %770 = vmatpush.msk.msra.mxu2 %vm351_vm0, %v345_v2  ;;  %772 = vmatpush.msk.msra.mxu3 %vm351_vm0, %v346_v3  ;;  %v341_v6 = vld [vmem:[%s288_s13 + $0x10] sm:$0xff]  ;;  %v342_v7 = vld [vmem:[%s288_s13 + $0x18] sm:$0xff]  ;;  %s298_s6 = scalar_lea.vmem [#allocation8], %s763_s10  ;;  %vm552_vm2 = vcmask 1041408   ;;  %vm554_vm3 = vcmask 1045508  }
  0x32   : > { %v338_v8 = vld [vmem:[#allocation5] sm:$0x3]  ;;  %379 = vmatpush.msra.mxu0 %v339_v4  ;;  %399 = vmatpush.msra.mxu1 %v340_v5  ;;  %v450_v9 = vld [vmem:[%s298_s6 + $0x30] sm:$0x1]  ;;  %v451_v10 = vld [vmem:[%s298_s6 + $0x38] sm:$0x1] }
  0x33   : > { %419 = vmatpush.msra.mxu2 %v341_v6  ;;  %439 = vmatpush.msra.mxu3 %v342_v7  ;;  %v448_v11 = vld [vmem:[%s298_s6 + $0x20] sm:$0x1]  ;;  %v449_v12 = vld [vmem:[%s298_s6 + $0x28] sm:$0x1]  ;;  %v446_v13 = vld [vmem:[%s298_s6 + $0x10] sm:$0xff]  ;;  %s790_s7 = sshll.u32 %s1079_s18, 3 }
  0x34   : > { %767 = vmatmul.msk.f32.vlgmr.msra.gmra.mxu0 %vm347_vm1, %v338_v8  ;;  %769 = vmatmul.msk.f32.vlgmr.msra.gmra.mxu1 %vm347_vm1, %v338_v8  ;;  %v447_v14 = vld [vmem:[%s298_s6 + $0x18] sm:$0xff]  ;;  %v444_v15 = vld [vmem:[%s298_s6] sm:$0xff]  ;;  %v445_v16 = vld [vmem:[%s298_s6 + $0x8] sm:$0xff]  ;;  %vm556_vm4 = vcmask 1043456   ;;  %s605_s14 = scalar_lea.hbm %s1323_s4, %s790_s7  ;;  %s333_s18 = scalar_lea.vmem [#allocation9], %s761_s27 }
  0x35   : > { %771 = vmatmul.msk.f32.vlgmr.msra.gmra.mxu2 %vm347_vm1, %v338_v8  ;;  %773 = vmatmul.msk.f32.vlgmr.msra.gmra.mxu3 %vm347_vm1, %v338_v8  ;;  %v544_v17 = vld [vmem:[%s1243_s25] sm:$0xff]  ;;  %s607_s22 = sshll.u32 %s333_s18, 4  ;;  %s609_s12 = sshll.u32 %s605_s14, 4  ;;  %s608_s22 = int_to_ptr.vmem [resolvable:$true] %s607_s22  ;;  %s610_s12 = int_to_ptr.hbm [resolvable:$true] %s609_s12 }
  0x36   : > { %778 = vmatpush.msk.msrb.mxu2 %vm351_vm0, %v450_v9  ;;  %780 = vmatpush.msk.msrb.mxu3 %vm351_vm0, %v451_v10  ;;  %561 = vst [vmem:[#allocation1] ss:$4 sm:$0xff] %v544_v17  ;;  %s592_s26 = scalar_lea.sflag [#allocation4], %s1238_s11  ;;  %s1011_s30 = sshra.s32 %s610_s12, 4  ;;  %s1012_s30 = int_to_ptr.hbm [resolvable:$true] %s1011_s30 }
  0x37   : > { %774 = vmatpush.msk.msrb.mxu0 %vm351_vm0, %v448_v11  ;;  %776 = vmatpush.msk.msrb.mxu1 %vm351_vm0, %v449_v12  ;;  %s1013_s5 = scalar_lea.hbm %s1012_s30, 8  ;;  %s1017_s25 = scalar_lea.hbm %s1323_s4, 16 }
  0x38   : > { %519 = vmatpush.msrb.mxu2 %v446_v13  ;;  %539 = vmatpush.msrb.mxu3 %v447_v14  ;;  %p1014_p7 = scmp.ne.s32.totalorder %s1012_s30, %s1013_s5  ;;  %p1018_p10 = scmp.lt.s32.totalorder %s1012_s30, %s1323_s4 }
  0x39   : > { %479 = vmatpush.msrb.mxu0 %v444_v15  ;;  %499 = vmatpush.msrb.mxu1 %v445_v16  ;;  %p1019_p11 = scmp.lt.s32.totalorder %s1017_s25, %s1013_s5 }
  0x3a   : > { %p1015_p8 = pnand %p1014_p7, %p1219_p0 }
  0x3b   : > { %p1020_p12 = por %p1019_p11, %p1018_p10 }
  0x3c   : > { %775 = vmatmul.msk.f32.vlgmr.msrb.gmra.mxu0 %vm347_vm1, %v338_v8  ;;  %777 = vmatmul.msk.f32.vlgmr.msrb.gmra.mxu1 %vm347_vm1, %v338_v8  ;;  %p1016_p9 = pneg %p1015_p8 }
  0x3d   : > { %779 = vmatmul.msk.f32.vlgmr.msrb.gmra.mxu2 %vm347_vm1, %v338_v8  ;;  %781 = vmatmul.msk.f32.vlgmr.msrb.gmra.mxu3 %vm347_vm1, %v338_v8  ;;  %v563_v22 = vld.sshfl [vmem:[#allocation1 + $0x8] sm:$0xff pattern:$0x73625140]  ;;  %v562_v25 = vld.sshfl [vmem:[#allocation1] sm:$0xff pattern:$0x73625140] }
  0x3e   : > { %v564_v26 = vld.sshfl [vmem:[#allocation1 + $0x10] sm:$0xff pattern:$0x73625140]  ;;  %v565_v31 = vld.sshfl [vmem:[#allocation1 + $0x18] sm:$0xff pattern:$0x73625140]  ;;  %p1021_p13 = pnand %p1020_p12, %p1016_p9 }
  0xb1   : > { %v401_v18 = vpop.f32.mrf.mxu1  ;;  %v381_v19 = vpop.f32.mrf.mxu0 }
  0xb2   : > { %v549_v27 = vrot.slane %v401_v18, 6 }
  0xb4   : > { %v553_v38 = vsel %vm552_vm2, %v381_v19, %v549_v27 }
  0xb8   : > { %v421_v20 = vpop.f32.mrf.mxu2  ;;  %v441_v21 = vpop.f32.mrf.mxu3 }
  0xb9   : > { %v501_v23 = vpop.f32.mrf.mxu1  ;;  %v550_v28 = vrot.slane %v421_v20, 4  ;;  %v551_v29 = vrot.slane %v441_v21, 2  ;;  %v481_v30 = vpop.f32.mrf.mxu0 }
  0xba   : > { %v571_v24 = vmul.f32 %v563_v22, %v501_v23  ;;  %v570_v35 = vmul.f32 %v562_v25, %v481_v30 }
  0xbb   : > { %v555_v39 = vsel %vm554_vm3, %v550_v28, %v551_v29 }
  0xbc   : > { %v575_v32 = vadd.f32 %v571_v24, %v401_v18  ;;  %v557_v43 = vsel %vm556_vm4, %v553_v38, %v555_v39  ;;  %v574_v44 = vadd.f32 %v570_v35, %v381_v19 }
  0xbd   : > { %vm559_vm5 = vcmp.gt.f32.partialorder %v544_v17, %v557_v43 }
  0xbe   : > { %v582_v40 = vrot.slane %v575_v32, 6 }
  0xc0   : > { %v521_v33 = vpop.f32.mrf.mxu2  ;;  %v541_v34 = vpop.f32.mrf.mxu3  ;;  %v585_v47 = vsel %vm552_vm2, %v574_v44, %v582_v40 }
  0xc1   : > { %v572_v36 = vmul.f32 %v564_v26, %v521_v33  ;;  %v573_v37 = vmul.f32 %v565_v31, %v541_v34 }
  0xc3   : > { %v576_v41 = vadd.f32 %v572_v36, %v421_v20  ;;  %v577_v42 = vadd.f32 %v573_v37, %v441_v21 }
  0xc5   : > { %v583_v45 = vrot.slane %v576_v41, 4  ;;  %v584_v46 = vrot.slane %v577_v42, 2 }
  0xc7   : > { %v586_v48 = vsel %vm554_vm3, %v583_v45, %v584_v46 }
  0xc8   : > { %v587_v49 = vsel %vm556_vm4, %v585_v47, %v586_v48 }
  0xc9   : > { %v589_v50 = vsel %vm559_vm5, %v544_v17, %v587_v49 }
  0xca   : > { %590 = vst [vmem:[%s333_s18] sm:$0xff] %v589_v50 }
  0xcb   : > { %1024 = shalt.err (!%p1021_p13)
}
  0xcc   : > { %801 = dma.vmem_to_hbm [thread:$0]  (%p1219_p0), %s608_s22, 128, %s610_s12, %s592_s26  }
  0xcd PF: > { %s621_s11 = sand.u32 1, %s1067_s15   ;;  %p818_p4 = pnand %p750_p3, %p1223_p2 }
  0xce   : > { %s622_s6 = scalar_lea.sflag [#allocation4], %s621_s11 }
  0xcf   : > { %p819_p5 = pneg %p818_p4 }
  0xd1   : > { %1062 = dma.done.wait (%p819_p5), %s622_s6, 128  }
  0xd2   : > { %1064 = vsyncadd (%p819_p5), %s622_s6, 4294967168  ;;  %s21_s20 = sadd.s32 1, %s1087_s20   ;;  %s1329_s15 = smov %s1071_s16 }
  0xd3   : > { %p18_p6 = scmp.ge.s32.totalorder %s21_s20, 4   ;;  %s1330_s16 = smov %s1075_s17 }
  0xd4   : > { %s1331_s17 = smov %s1170_s28  ;;  %s1332_s18 = smov %s1083_s19 }
  0xd5   : > { %s1333_s19 = smov %s1335_s21  ;;  %20 = sbr.rel (!%p18_p6) target bundleno = 7 (0x7), region = 108 }
  0xda   :  { %628 = vsyncpa [#allocation3], 1 }
  0xdb   :  { %630 = vsyncpa [#allocation3 + $0x1], 1 }
  0xdc   :  { %631 = vsyncpa [#allocation6], 1 }
  0xdd   :  { %632 = vsyncpa [#allocation4], 1 }
  0xde   :  { %634 = vsyncpa [#allocation4 + $0x1], 1 }

</bundles_post_ra>
